<compile_context>
chip_gen: v6e
topology: v6e:2x2x1
jax: 0.10.0
libtpu: 0.0.40
codegen_flags: <defaults>
</compile_context>

<pallas_src>
import jax
import jax.numpy as jnp
from jax.experimental import pallas as pl
from jax.experimental.pallas import tpu as pltpu


def gnn_expert_kernel(a_ref, x_ref, w1_ref, b1_ref, w2_ref, b2_ref,
                      p_ref, ws_ref, bs_ref, out_ref):
    # a_ref: [M, M] bf16 block-diagonal normalized adjacency (M = GB*N)
    # x_ref: [M, F] bf16 stacked node features for GB graphs
    a = a_ref[...]
    x = x_ref[...]

    # --- GCNConv 1: relu((A @ X) @ W1 + b1); contract A over F (16) first ---
    ax = jnp.dot(a, x, preferred_element_type=jnp.float32)              # [M,F]
    h = jnp.dot(ax.astype(jnp.bfloat16), w1_ref[...],
                preferred_element_type=jnp.float32) + b1_ref[...]       # [M,H]
    h = jnp.maximum(h, 0.0)

    # F.dropout(p=0.1, training=False) -> identity (inference semantics)

    # --- GCNConv 2: relu(A @ (H @ W2) + b2) ----------------------------------
    hw = jnp.dot(h.astype(jnp.bfloat16), w2_ref[...],
                 preferred_element_type=jnp.float32)                    # [M,H]
    h2 = jnp.dot(a, hw.astype(jnp.bfloat16),
                 preferred_element_type=jnp.float32) + b2_ref[...]      # [M,H]
    h2 = jnp.maximum(h2, 0.0)

    # --- global_mean_pool for all GB graphs in one matmul (f32) --------------
    pooled = jnp.dot(p_ref[...], h2,
                     preferred_element_type=jnp.float32)                # [rows,H]

    # --- score head on VPU/XLU: sum(pooled * ws_row) + bs --------------------
    scores = jnp.sum(pooled * ws_ref[...], axis=-1, keepdims=True) + bs_ref[0, 0]

    # lane-dense packed write: score of graph g broadcast across sublane g
    out_ref[...] = jnp.broadcast_to(scores, out_ref.shape)


def _build_adjacency(edge_index, edge_attr, n, we, be):
    """edge_nn gate + PyG gcn_norm (self-loops, D^-1/2 A D^-1/2) -> dense A."""
    f32 = jnp.float32
    edge_weight = jax.nn.sigmoid(edge_attr @ we + be).reshape(-1)          # [E]
    row = jnp.concatenate([edge_index[0], jnp.arange(n)])                  # sources
    col = jnp.concatenate([edge_index[1], jnp.arange(n)])                  # targets
    ew = jnp.concatenate([edge_weight, jnp.ones((n,), f32)])
    deg = jnp.zeros((n,), f32).at[col].add(ew)
    dis = jnp.where(deg > 0, jax.lax.rsqrt(deg), 0.0)
    norm = dis[row] * ew * dis[col]
    # TODO(synk): data-dependent sparse scatter has no clean Pallas equivalent;
    # adjacency densified in JAX glue (block-sparse/CSR prefetch is future work).
    return jnp.zeros((n, n), f32).at[col, row].add(norm)                   # [N,N]


def _pick_graphs_per_block(g, n):
    """Largest divisor of g with gb*n <= 256 (one MXU pass on v6e/v7x)."""
    gb = 1
    for cand in range(1, g + 1):
        if g % cand == 0 and cand * n <= 256:
            gb = cand
    return gb


def _gnn_expert_forward_batched(x, edge_index, edge_attr, params):
    """x: [G,N,F], edge_index: [G,2,E], edge_attr: [G,E,8] -> scores [G,1]."""
    g, n, f_in = x.shape
    h = params["w1"].shape[1]
    f32, bf16 = jnp.float32, jnp.bfloat16

    # per-graph dense normalized adjacency (edge_nn gate + gcn_norm)
    a = jax.vmap(lambda ei, ea: _build_adjacency(ei, ea, n,
                                                 params["we"], params["be"])
                 )(edge_index, edge_attr)                                  # [G,N,N]

    # graphs-per-block / block-diagonal packing
    gb = _pick_graphs_per_block(g, n)
    num_blocks = g // gb
    m = gb * n
    rows = ((gb + 7) // 8) * 8                                             # output sublanes

    a_blocks = a.reshape(num_blocks, gb, n, n).astype(bf16)
    eye_g = jnp.eye(gb, dtype=bf16)
    # block-diag: A_bd[b, g*n+i, h*n+j] = A[b,g,i,j] * (g==h)
    a_bd = jnp.einsum('bgij,gh->bgihj', a_blocks, eye_g).reshape(num_blocks, m, m)

    x_flat = x.reshape(num_blocks, m, f_in).astype(bf16)                   # stacked features

    # block-averaging pool matrix: P[g, g*n + i] = 1/n, zero-padded to `rows`
    p = jnp.repeat(jnp.eye(gb, dtype=f32), n, axis=1) / n                  # [gb, m]
    p = jnp.pad(p, ((0, rows - gb), (0, 0)))                               # [rows, m]

    w1 = params["w1"].astype(bf16)
    w2 = params["w2"].astype(bf16)
    ws_row = params["ws"].T                                                # [1,H] f32

    shared2d = lambda shape: pl.BlockSpec(shape, lambda i: (0, 0))
    out = pl.pallas_call(
        gnn_expert_kernel,
        out_shape=jax.ShapeDtypeStruct((num_blocks, rows, 128), f32),
        grid=(num_blocks,),
        in_specs=[
            pl.BlockSpec((None, m, m), lambda i: (i, 0, 0)),       # A block-diag per block
            pl.BlockSpec((None, m, f_in), lambda i: (i, 0, 0)),    # X stacked per block
            shared2d((f_in, h)),                                    # W1 (VMEM-resident)
            shared2d((1, h)),                                       # b1
            shared2d((h, h)),                                       # W2
            shared2d((1, h)),                                       # b2
            shared2d((rows, m)),                                    # pool matrix
            shared2d((1, h)),                                       # ws (row)
            pl.BlockSpec(memory_space=pltpu.MemorySpace.SMEM),      # bs scalar
        ],
        out_specs=pl.BlockSpec((None, rows, 128), lambda i: (i, 0, 0)),
        compiler_params=pltpu.CompilerParams(
            dimension_semantics=("parallel",)),
    )(a_bd, x_flat, w1, params["b1"], w2, params["b2"], p, ws_row, params["bs"])

    return out[:, :gb, 0].reshape(g, 1)                                    # [G,1]


def gnn_expert_forward(x, edge_index, edge_attr, params):
    """Single graph ([N,F],[2,E],[E,8]) -> [1,1], or batched ([G,...]) -> [G,1]."""
    single = x.ndim == 2
    if single:
        x, edge_index, edge_attr = x[None], edge_index[None], edge_attr[None]
    out = _gnn_expert_forward_batched(x, edge_index, edge_attr, params)
    return out[0:1] if single else out


def _reference_forward(x, edge_index, edge_attr, params):
    """Pure-JAX f32 reference (same math, no bf16, no packing)."""
    def one(xg, eig, eag):
        n = xg.shape[0]
        a = _build_adjacency(eig, eag, n, params["we"], params["be"])
        hh = jnp.maximum(a @ (xg @ params["w1"]) + params["b1"], 0.0)
        hh = jnp.maximum(a @ (hh @ params["w2"]) + params["b2"], 0.0)
        pooled = jnp.mean(hh, axis=0, keepdims=True)
        return pooled @ params["ws"] + params["bs"]                        # [1,1]
    return jax.vmap(one)(x, edge_index, edge_attr)[:, 0, :]                # [G,1]


def init_params(key, num_node_features, hidden_channels):
    ks = jax.random.split(key, 8)
    s = 0.1
    return {
        # conv1 / conv2 linear weights stored as [in, out]
        "w1": s * jax.random.normal(ks[0], (num_node_features, hidden_channels), jnp.float32),
        "b1": s * jax.random.normal(ks[1], (1, hidden_channels), jnp.float32),
        "w2": s * jax.random.normal(ks[2], (hidden_channels, hidden_channels), jnp.float32),
        "b2": s * jax.random.normal(ks[3], (1, hidden_channels), jnp.float32),
        # edge_nn: Linear(8, 1)
        "we": s * jax.random.normal(ks[4], (8, 1), jnp.float32),
        "be": s * jax.random.normal(ks[5], (1,), jnp.float32),
        # score: Linear(hidden, 1)
        "ws": s * jax.random.normal(ks[6], (hidden_channels, 1), jnp.float32),
        "bs": s * jax.random.normal(ks[7], (1, 1), jnp.float32),
    }


if __name__ == "__main__":
    key = jax.random.PRNGKey(0)
    k_x, k_e, k_p = jax.random.split(key, 3)

    num_graphs = 8
    num_nodes = 16
    num_node_features = 16
    hidden_channels = 32

    # node features for a batch of independent graphs
    x = jax.random.normal(k_x, (num_graphs, num_nodes, num_node_features), jnp.float32)

    # deterministic bidirectional ring graph (same structure each graph, E = 2N)
    src = jnp.arange(num_nodes, dtype=jnp.int32)
    dst = (src + 1) % num_nodes
    ei = jnp.stack([jnp.concatenate([src, dst]),
                    jnp.concatenate([dst, src])], axis=0)                  # [2, 32]
    edge_index = jnp.tile(ei[None], (num_graphs, 1, 1))                    # [G, 2, 32]
    edge_attr = jax.random.normal(k_e, (num_graphs, ei.shape[1], 8), jnp.float32)

    params = init_params(k_p, num_node_features, hidden_channels)

    scores = gnn_expert_forward(x, edge_index, edge_attr, params)          # [G, 1]
    jax.block_until_ready(scores)
    assert scores.shape == (num_graphs, 1)

    # single-graph path (original module semantics)
    score_one = gnn_expert_forward(x[0], edge_index[0], edge_attr[0], params)
    jax.block_until_ready(score_one)
    assert score_one.shape == (1, 1)

    # check vs. f32 reference (kernel feeds the MXU bf16 operands, f32 accum)
    ref = _reference_forward(x, edge_index, edge_attr, params)
    assert jnp.allclose(scores, ref, rtol=1e-1, atol=5e-2)
    assert jnp.allclose(score_one, ref[0:1], rtol=1e-1, atol=5e-2)

    print("KERNEL_OK")
</pallas_src>

<mosaic_0001>
module attributes {stable_mosaic.version = 11 : i64} {
  func.func @gnn_expert_kernel(%arg0: i32, %arg1: memref<1x128x128xbf16, #tpu.memory_space<vmem>>, %arg2: memref<1x128x16xbf16, #tpu.memory_space<vmem>>, %arg3: memref<16x32xbf16, #tpu.memory_space<vmem>>, %arg4: memref<1x32xf32, #tpu.memory_space<vmem>>, %arg5: memref<32x32xbf16, #tpu.memory_space<vmem>>, %arg6: memref<1x32xf32, #tpu.memory_space<vmem>>, %arg7: memref<8x128xf32, #tpu.memory_space<vmem>>, %arg8: memref<1x32xf32, #tpu.memory_space<vmem>>, %arg9: memref<1x1xf32, #tpu.memory_space<smem>>, %arg10: memref<1x8x128xf32, #tpu.memory_space<vmem>>) attributes {dimension_semantics = [#tpu.dimension_semantics<parallel>], iteration_bounds = array<i64: 1>, scalar_prefetch = 0 : i64, scratch_operands = 0 : i64, tpu.core_type = #tpu.core_type<tc>, window_params = [{transform_indices = @transform_0, window_bounds = array<i64: 1, 128, 128>}, {transform_indices = @transform_1, window_bounds = array<i64: 1, 128, 16>}, {pipeline_mode = #tpu.pipeline_mode<synchronous>, transform_indices = @transform_2, window_bounds = array<i64: 16, 32>}, {pipeline_mode = #tpu.pipeline_mode<synchronous>, transform_indices = @transform_3, window_bounds = array<i64: 1, 32>}, {pipeline_mode = #tpu.pipeline_mode<synchronous>, transform_indices = @transform_4, window_bounds = array<i64: 32, 32>}, {pipeline_mode = #tpu.pipeline_mode<synchronous>, transform_indices = @transform_5, window_bounds = array<i64: 1, 32>}, {pipeline_mode = #tpu.pipeline_mode<synchronous>, transform_indices = @transform_6, window_bounds = array<i64: 8, 128>}, {pipeline_mode = #tpu.pipeline_mode<synchronous>, transform_indices = @transform_7, window_bounds = array<i64: 1, 32>}, {transform_indices = @transform_8, window_bounds = array<i64: 1, 1>}, {transform_indices = @transform_9, window_bounds = array<i64: 1, 8, 128>}]} {
    %c0 = arith.constant 0 : index
    %c0_0 = arith.constant 0 : index
    %c0_1 = arith.constant 0 : index
    %0 = vector.load %arg1[%c0, %c0_0, %c0_1] : memref<1x128x128xbf16, #tpu.memory_space<vmem>>, vector<1x128x128xbf16>
    %1 = vector.shape_cast %0 : vector<1x128x128xbf16> to vector<128x128xbf16>
    %c0_2 = arith.constant 0 : index
    %c0_3 = arith.constant 0 : index
    %c0_4 = arith.constant 0 : index
    %2 = vector.load %arg2[%c0_2, %c0_3, %c0_4] : memref<1x128x16xbf16, #tpu.memory_space<vmem>>, vector<1x128x16xbf16>
    %3 = vector.shape_cast %2 : vector<1x128x16xbf16> to vector<128x16xbf16>
    %cst = arith.constant dense<0.000000e+00> : vector<128x16xf32>
    %4 = tpu.matmul %1, %3, %cst {dimension_numbers = #tpu.dot_dimension_numbers<[1], [0], [0], [1], [0, 0, 1, 1], [], []>} : vector<128x128xbf16>, vector<128x16xbf16>, vector<128x16xf32> -> vector<128x16xf32>
    %5 = arith.truncf %4 : vector<128x16xf32> to vector<128x16xbf16>
    %c0_5 = arith.constant 0 : index
    %c0_6 = arith.constant 0 : index
    %6 = vector.load %arg3[%c0_5, %c0_6] : memref<16x32xbf16, #tpu.memory_space<vmem>>, vector<16x32xbf16>
    %cst_7 = arith.constant dense<0.000000e+00> : vector<128x32xf32>
    %7 = tpu.matmul %5, %6, %cst_7 {dimension_numbers = #tpu.dot_dimension_numbers<[1], [0], [0], [1], [0, 0, 1, 1], [], []>} : vector<128x16xbf16>, vector<16x32xbf16>, vector<128x32xf32> -> vector<128x32xf32>
    %c0_8 = arith.constant 0 : index
    %c0_9 = arith.constant 0 : index
    %8 = vector.load %arg4[%c0_8, %c0_9] : memref<1x32xf32, #tpu.memory_space<vmem>>, vector<1x32xf32>
    %9 = vector.broadcast %8 : vector<1x32xf32> to vector<128x32xf32>
    %10 = arith.addf %7, %9 : vector<128x32xf32>
    %cst_10 = arith.constant 0.000000e+00 : f32
    %11 = vector.broadcast %cst_10 : f32 to vector<128x32xf32>
    %12 = arith.maximumf %10, %11 : vector<128x32xf32>
    %13 = arith.truncf %12 : vector<128x32xf32> to vector<128x32xbf16>
    %c0_11 = arith.constant 0 : index
    %c0_12 = arith.constant 0 : index
    %14 = vector.load %arg5[%c0_11, %c0_12] : memref<32x32xbf16, #tpu.memory_space<vmem>>, vector<32x32xbf16>
    %cst_13 = arith.constant dense<0.000000e+00> : vector<128x32xf32>
    %15 = tpu.matmul %13, %14, %cst_13 {dimension_numbers = #tpu.dot_dimension_numbers<[1], [0], [0], [1], [0, 0, 1, 1], [], []>} : vector<128x32xbf16>, vector<32x32xbf16>, vector<128x32xf32> -> vector<128x32xf32>
    %16 = arith.truncf %15 : vector<128x32xf32> to vector<128x32xbf16>
    %cst_14 = arith.constant dense<0.000000e+00> : vector<128x32xf32>
    %17 = tpu.matmul %1, %16, %cst_14 {dimension_numbers = #tpu.dot_dimension_numbers<[1], [0], [0], [1], [0, 0, 1, 1], [], []>} : vector<128x128xbf16>, vector<128x32xbf16>, vector<128x32xf32> -> vector<128x32xf32>
    %c0_15 = arith.constant 0 : index
    %c0_16 = arith.constant 0 : index
    %18 = vector.load %arg6[%c0_15, %c0_16] : memref<1x32xf32, #tpu.memory_space<vmem>>, vector<1x32xf32>
    %19 = vector.broadcast %18 : vector<1x32xf32> to vector<128x32xf32>
    %20 = arith.addf %17, %19 : vector<128x32xf32>
    %cst_17 = arith.constant 0.000000e+00 : f32
    %21 = vector.broadcast %cst_17 : f32 to vector<128x32xf32>
    %22 = arith.maximumf %20, %21 : vector<128x32xf32>
    %c0_18 = arith.constant 0 : index
    %c0_19 = arith.constant 0 : index
    %23 = vector.load %arg7[%c0_18, %c0_19] : memref<8x128xf32, #tpu.memory_space<vmem>>, vector<8x128xf32>
    %cst_20 = arith.constant dense<0.000000e+00> : vector<8x32xf32>
    %24 = tpu.matmul %23, %22, %cst_20 {dimension_numbers = #tpu.dot_dimension_numbers<[1], [0], [0], [1], [0, 0, 1, 1], [], []>} : vector<8x128xf32>, vector<128x32xf32>, vector<8x32xf32> -> vector<8x32xf32>
    %c0_21 = arith.constant 0 : index
    %c0_22 = arith.constant 0 : index
    %25 = vector.load %arg8[%c0_21, %c0_22] : memref<1x32xf32, #tpu.memory_space<vmem>>, vector<1x32xf32>
    %26 = vector.broadcast %25 : vector<1x32xf32> to vector<8x32xf32>
    %27 = arith.mulf %24, %26 : vector<8x32xf32>
    %cst_23 = arith.constant dense<0.000000e+00> : vector<8xf32>
    %28 = vector.multi_reduction <add>, %27, %cst_23 [1] : vector<8x32xf32> to vector<8xf32>
    %29 = vector.shape_cast %28 : vector<8xf32> to vector<8x1xf32>
    %c0_24 = arith.constant 0 : index
    %c0_25 = arith.constant 0 : index
    %30 = memref.load %arg9[%c0_24, %c0_25] : memref<1x1xf32, #tpu.memory_space<smem>>
    %31 = vector.broadcast %30 : f32 to vector<8x1xf32>
    %32 = arith.addf %29, %31 : vector<8x1xf32>
    %33 = vector.shape_cast %32 : vector<8x1xf32> to vector<8x1xf32>
    %34 = vector.broadcast %33 : vector<8x1xf32> to vector<8x128xf32>
    %c0_26 = arith.constant 0 : index
    %c0_27 = arith.constant 0 : index
    %c0_28 = arith.constant 0 : index
    %35 = vector.load %arg10[%c0_26, %c0_27, %c0_28] : memref<1x8x128xf32, #tpu.memory_space<vmem>>, vector<1x8x128xf32>
    %36 = vector.shape_cast %35 : vector<1x8x128xf32> to vector<8x128xf32>
    %37 = vector.shape_cast %34 : vector<8x128xf32> to vector<1x8x128xf32>
    tpu.vector_store %arg10[%c0_26, %c0_27, %c0_28], %37 {strides = array<i32>} : memref<1x8x128xf32, #tpu.memory_space<vmem>>, vector<1x8x128xf32>,
    return
  }
  func.func @transform_0(%arg0: i32) -> (i32, i32, i32) {
    %c0_i32 = arith.constant 0 : i32
    %c0_i32_0 = arith.constant 0 : i32
    %c0_i32_1 = arith.constant 0 : i32
    return %arg0, %c0_i32, %c0_i32_0 : i32, i32, i32
  }
  func.func @transform_1(%arg0: i32) -> (i32, i32, i32) {
    %c0_i32 = arith.constant 0 : i32
    %c0_i32_0 = arith.constant 0 : i32
    %c0_i32_1 = arith.constant 0 : i32
    return %arg0, %c0_i32, %c0_i32_0 : i32, i32, i32
  }
  func.func @transform_2(%arg0: i32) -> (i32, i32) {
    %c0_i32 = arith.constant 0 : i32
    %c0_i32_0 = arith.constant 0 : i32
    %c0_i32_1 = arith.constant 0 : i32
    return %c0_i32, %c0_i32_0 : i32, i32
  }
  func.func @transform_3(%arg0: i32) -> (i32, i32) {
    %c0_i32 = arith.constant 0 : i32
    %c0_i32_0 = arith.constant 0 : i32
    %c0_i32_1 = arith.constant 0 : i32
    return %c0_i32, %c0_i32_0 : i32, i32
  }
  func.func @transform_4(%arg0: i32) -> (i32, i32) {
    %c0_i32 = arith.constant 0 : i32
    %c0_i32_0 = arith.constant 0 : i32
    %c0_i32_1 = arith.constant 0 : i32
    return %c0_i32, %c0_i32_0 : i32, i32
  }
  func.func @transform_5(%arg0: i32) -> (i32, i32) {
    %c0_i32 = arith.constant 0 : i32
    %c0_i32_0 = arith.constant 0 : i32
    %c0_i32_1 = arith.constant 0 : i32
    return %c0_i32, %c0_i32_0 : i32, i32
  }
  func.func @transform_6(%arg0: i32) -> (i32, i32) {
    %c0_i32 = arith.constant 0 : i32
    %c0_i32_0 = arith.constant 0 : i32
    %c0_i32_1 = arith.constant 0 : i32
    return %c0_i32, %c0_i32_0 : i32, i32
  }
  func.func @transform_7(%arg0: i32) -> (i32, i32) {
    %c0_i32 = arith.constant 0 : i32
    %c0_i32_0 = arith.constant 0 : i32
    %c0_i32_1 = arith.constant 0 : i32
    return %c0_i32, %c0_i32_0 : i32, i32
  }
  func.func @transform_8(%arg0: i32) -> (i32, i32) {
    %c0_i32 = arith.constant 0 : i32
    %c0_i32_0 = arith.constant 0 : i32
    %c0_i32_1 = arith.constant 0 : i32
    return %c0_i32, %c0_i32_0 : i32, i32
  }
  func.func @transform_9(%arg0: i32) -> (i32, i32, i32) {
    %c0_i32 = arith.constant 0 : i32
    %c0_i32_0 = arith.constant 0 : i32
    %c0_i32_1 = arith.constant 0 : i32
    return %arg0, %c0_i32, %c0_i32_0 : i32, i32, i32
  }
}

</mosaic_0001>

<bundles_post_ra>
// kernel: tpu_custom_call.1
= control target key start
LH: loop header
LB: loop body
LE: loop exit
PB: predicated region body
PF: predicated region fallthrough
CT: control target
= control target key end

     0   :  { %15 = vsyncpa [#allocation4], 0  ;;  %s1358_s0 = inlined_call_operand.vmem [shape: bf16[1,128,128], index: 0, kind: input, shape index: {}]   ;;  %s1359_s1 = inlined_call_operand.vmem [shape: bf16[1,128,16], index: 1, kind: input, shape index: {}]   ;;  %s1360_s2 = inlined_call_operand.hbm [shape: bf16[16,32], index: 2, kind: input, shape index: {}]   ;;  %s1361_s3 = inlined_call_operand.vmem [shape: f32[1,32], index: 3, kind: input, shape index: {}]   ;;  %s1362_s4 = inlined_call_operand.vmem [shape: bf16[32,32], index: 4, kind: input, shape index: {}]   ;;  %s1363_s5 = inlined_call_operand.vmem [shape: f32[1,32], index: 5, kind: input, shape index: {}]   ;;  %s1364_s6 = inlined_call_operand.hbm [shape: f32[8,128], index: 6, kind: input, shape index: {}]   ;;  %s1365_s7 = inlined_call_operand.vmem [shape: f32[1,32], index: 7, kind: input, shape index: {}]   ;;  %s1366_s8 = inlined_call_operand.<no memory space> [shape: f32[1,1], index: 8, kind: input, shape index: {}]   ;;  %s1367_s9 = inlined_call_operand.hbm [shape: f32[1,8,128], index: 9, kind: output, shape index: {}]  }
   0x1   :  { %16 = vsyncpa [#allocation7], 0 }
   0x2   :  { %17 = vsyncpa [#allocation5], 0  ;;  %s1158_s30 = smov [#allocation3]  }
   0x3   :  { %s27_s10 = sshll.u32 %s1158_s30, 4  ;;  %s28_s10 = int_to_ptr.vmem [resolvable:$true] %s27_s10 }
   0x4   :  { %s1100_s11 = scalar_lea.vmem %s28_s10, 128  ;;  %p1105_p1 = scmp.lt.s32.totalorder %s28_s10, %s28_s10 }
   0x5   :  { %p1101_p0 = scmp.ne.s32.totalorder %s28_s10, %s1100_s11  ;;  %p1106_p2 = scmp.lt.s32.totalorder %s1100_s11, %s1100_s11 }
   0x7   :  { %p1107_p3 = por %p1106_p2, %p1105_p1 }
   0x9   :  { %p1108_p4 = pnand %p1107_p3, %p1101_p0 }
   0xb   :  { %1111 = shalt.err (!%p1108_p4)
}
   0xc   :  { %s1159_s12 = smov 64   ;;  %s1160_s13 = smov 4  }
   0xd   :  { %33 = dma.hbm_to_vmem [thread:$0]  %s1360_s2, 128, %s28_s10, [#allocation4], %s1159_s12, %s1159_s12, %s1160_s13  }
   0xe   :  { %s1161_s16 = smov [#allocation6]  }
   0xf   :  { %s46_s17 = sshll.u32 %s1161_s16, 4  ;;  %s47_s17 = int_to_ptr.vmem [resolvable:$true] %s46_s17 }
  0x10   :  { %s1120_s18 = scalar_lea.vmem %s47_s17, 128  ;;  %p1125_p6 = scmp.lt.s32.totalorder %s47_s17, %s47_s17 }
  0x11   :  { %p1121_p5 = scmp.ne.s32.totalorder %s47_s17, %s1120_s18  ;;  %p1126_p7 = scmp.lt.s32.totalorder %s1120_s18, %s1120_s18 }
  0x13   :  { %p1127_p8 = por %p1126_p7, %p1125_p6 }
  0x15   :  { %p1128_p9 = pnand %p1127_p8, %p1121_p5 }
  0x17   :  { %1131 = shalt.err (!%p1128_p9)
}
  0x18   :  { %49 = dma.hbm_to_vmem [thread:$0]  %s1364_s6, 128, %s47_s17, [#allocation7]  }
  0x19   :  { %1152 = dma.done.wait [#allocation4], 128  }
  0x1a   :  { %1153 = vsyncadd [#allocation4], 4294967168 }
  0x1b   :  { %1154 = dma.done.wait [#allocation7], 128  }
  0x1c   :  { %1155 = vsyncadd [#allocation7], 4294967168  ;;  %v1073_v0 = vld [vmem:[%s1359_s1 + $0x38] sm:$0xff]   ;;  %v1074_v1 = vld [vmem:[%s1359_s1 + $0x30] sm:$0xff]   ;;  %vm309_vm0 = vcmask 130048   ;;  %vm471_vm1 = vcmask 261120  }
  0x1d   :  { %929 = vmatprep.subr.bf16.mxu0 %v1073_v0  ;;  %v1075_v2 = vld [vmem:[%s1359_s1 + $0x28] sm:$0xff]   ;;  %v1076_v3 = vld [vmem:[%s1359_s1 + $0x20] sm:$0xff]   ;;  %v1077_v5 = vld [vmem:[%s1359_s1 + $0x18] sm:$0xff]   ;;  %vm1163_vm2 = vmmov 0   ;;  %s1164_s14 = smov [#allocation8]  }
  0x1e   :  { %930 = vmatpush3.bf16.msra.mxu0 %v1073_v0  ;;  %v1081_v4 = vld [vmem:[%s1358_s0] sm:$0xff]   ;;  %v1078_v6 = vld [vmem:[%s1359_s1 + $0x10] sm:$0xff]   ;;  %v1079_v7 = vld [vmem:[%s1359_s1 + $0x8] sm:$0xff]   ;;  %s813_s15 = sshll.u32 %s1164_s14, 4  ;;  %s814_s15 = int_to_ptr.vmem [resolvable:$true] %s813_s15 }
  0x1f   :  { %931 = vmatprep.subr.bf16.mxu0 %v1074_v1  ;;  %945 = vmatprep.mubr.bf16.mxu0 %v1081_v4  ;;  %v1080_v8 = vld [vmem:[%s1359_s1] sm:$0xff]   ;;  %v1251_v9 = vld [vmem:[%s1358_s0 + $0x8] sm:$0xff]   ;;  %v1256_v10 = vld [vmem:[%s1358_s0 + $0x10] sm:$0xff]   ;;  %s1132_s16 = scalar_lea.vmem %s814_s15, 128  ;;  %p1137_p11 = scmp.lt.s32.totalorder %s814_s15, %s814_s15 }
  0x20   :  { %v1263_v11 = vld [vmem:[%s1358_s0 + $0x18] sm:$0xff]   ;;  %v1268_v12 = vld [vmem:[%s1358_s0 + $0x20] sm:$0xff]   ;;  %v1275_v13 = vld [vmem:[%s1358_s0 + $0x28] sm:$0xff]   ;;  %p1133_p10 = scmp.ne.s32.totalorder %s814_s15, %s1132_s16  ;;  %p1138_p12 = scmp.lt.s32.totalorder %s1132_s16, %s1132_s16 }
  0x21   :  { %v1280_v14 = vld [vmem:[%s1358_s0 + $0x30] sm:$0xff]   ;;  %v1287_v15 = vld [vmem:[%s1358_s0 + $0x38] sm:$0xff]   ;;  %v1089_v16 = vld [vmem:[#allocation3] sm:$0xff]  }
  0x22   :  { %932 = vmatpush3.bf16.msra.mxu0 %v1074_v1  ;;  %961 = vmatprep.subr.bf16.mxu1 %v1089_v16  ;;  %v1090_v17 = vld [vmem:[%s1362_s4 + $0x8] sm:$0xff]   ;;  %v1091_v25 = vld [vmem:[%s1362_s4] sm:$0xff]   ;;  %p1139_p13 = por %p1138_p12, %p1137_p11 }
  0x23   :  { %933 = vmatprep.subr.bf16.mxu0 %v1075_v2  ;;  %962 = vmatpush3.bf16.msra.mxu1 %v1089_v16  ;;  %v839_v45 = vld [vmem:[%s1361_s3] ss:$0 sm:$0xff] }
  0x24   :  { %979 = vmatprep.subr.bf16.mxu1 %v1090_v17  ;;  %p1140_p0 = pnand %p1139_p13, %p1133_p10 }
  0x26   :  { %934 = vmatpush3.bf16.msra.mxu0 %v1075_v2 }
  0x27   :  { %935 = vmatprep.subr.bf16.mxu0 %v1076_v3 }
  0x2a   :  { %936 = vmatpush3.bf16.msra.mxu0 %v1076_v3 }
  0x2b   :  { %937 = vmatprep.subr.bf16.mxu0 %v1077_v5 }
  0x2e   :  { %938 = vmatpush3.bf16.msra.mxu0 %v1077_v5 }
  0x2f   :  { %939 = vmatprep.subr.bf16.mxu0 %v1078_v6 }
  0x32   :  { %940 = vmatpush3.bf16.msra.mxu0 %v1078_v6 }
  0x33   :  { %941 = vmatprep.subr.bf16.mxu0 %v1079_v7 }
  0x36   :  { %942 = vmatpush3.bf16.msra.mxu0 %v1079_v7 }
  0x37   :  { %943 = vmatprep.subr.bf16.mxu0 %v1080_v8 }
  0x3a   :  { %944 = vmatpush3.bf16.msra.mxu0 %v1080_v8 }
  0x3d   :  { %946 = vmatmul.mubr.bf16.vlgmr.msra.gmra.mxu0 %v1251_v9 }
  0x3e   :  { %949 = vmatprep.mubr.bf16.mxu0 %v1256_v10 }
  0x45   :  { %950 = vmatmul.mubr.bf16.gmra.mxu0 %v1263_v11 }
  0x46   :  { %953 = vmatprep.mubr.bf16.mxu0 %v1268_v12 }
  0x4d   :  { %954 = vmatmul.mubr.bf16.gmra.mxu0 %v1275_v13 }
  0x4e   :  { %957 = vmatprep.mubr.bf16.mxu0 %v1280_v14 }
  0x55   :  { %958 = vmatmul.mubr.bf16.gmra.mxu0 %v1287_v15 }
  0x56   :  { %1015 = vmatprep.mubr.bf16.mxu0 %v1081_v4 }
  0xfd   :  { %v947_v18 = vpop.f32.mrf.mxu0 }
  0xff   :  { %v223_v19 = vpop.f32.mrf.mxu0 }
 0x101   :  { %v948_v20 = vpop.f32.mrf.mxu0 }
 0x102   :  { %v287_v23 = vpack.c.bf16 %v948_v20, %v947_v18 }
 0x103   :  { %v226_v21 = vpop.f32.mrf.mxu0 }
 0x104   :  { %v286_v22 = vpack.c.bf16 %v226_v21, %v223_v19 }
 0x105   :  { %v951_v24 = vpop.f32.mrf.mxu0 }
 0x106   :  { %963 = vmatprep.mubr.msk.bf16.mxu1 %vm309_vm0, %v286_v22 }
 0x107   :  { %v239_v26 = vpop.f32.mrf.mxu0  ;;  %964 = vmatmul.mubr.msk.bf16.vlgmr.msra.gmra.mxu1 %vm309_vm0, %v287_v23 }
 0x108   :  { %980 = vmatpush3.bf16.msra.mxu1 %v1090_v17 }
 0x109   :  { %v952_v27 = vpop.f32.mrf.mxu0  ;;  %981 = vmatprep.subr.bf16.mxu1 %v1091_v25 }
 0x10a   :  { %v289_v30 = vpack.c.bf16 %v952_v27, %v951_v24 }
 0x10b   :  { %v242_v28 = vpop.f32.mrf.mxu0 }
 0x10c   :  { %v288_v29 = vpack.c.bf16 %v242_v28, %v239_v26  ;;  %982 = vmatpush3.bf16.msra.mxu1 %v1091_v25 }
 0x10d   :  { %v955_v31 = vpop.f32.mrf.mxu0 }
 0x10e   :  { %967 = vmatprep.mubr.msk.bf16.mxu1 %vm309_vm0, %v288_v29 }
 0x10f   :  { %v255_v32 = vpop.f32.mrf.mxu0  ;;  %968 = vmatmul.mubr.msk.bf16.gmra.mxu1 %vm309_vm0, %v289_v30 }
 0x111   :  { %v956_v33 = vpop.f32.mrf.mxu0 }
 0x112   :  { %v291_v36 = vpack.c.bf16 %v956_v33, %v955_v31 }
 0x113   :  { %v258_v34 = vpop.f32.mrf.mxu0 }
 0x114   :  { %v290_v35 = vpack.c.bf16 %v258_v34, %v255_v32 }
 0x115   :  { %v959_v37 = vpop.f32.mrf.mxu0 }
 0x116   :  { %971 = vmatprep.mubr.msk.bf16.mxu1 %vm309_vm0, %v290_v35 }
 0x117   :  { %v271_v38 = vpop.f32.mrf.mxu0  ;;  %972 = vmatmul.mubr.msk.bf16.gmra.mxu1 %vm309_vm0, %v291_v36 }
 0x119   :  { %v960_v39 = vpop.f32.mrf.mxu0 }
 0x11a   :  { %v293_v42 = vpack.c.bf16 %v960_v39, %v959_v37 }
 0x11b   :  { %v274_v40 = vpop.f32.mrf.mxu0 }
 0x11c   :  { %v292_v41 = vpack.c.bf16 %v274_v40, %v271_v38 }
 0x11e   :  { %975 = vmatprep.mubr.msk.bf16.mxu1 %vm309_vm0, %v292_v41 }
 0x11f   :  { %976 = vmatmul.mubr.msk.bf16.gmra.mxu1 %vm309_vm0, %v293_v42 }
 0x1c7   :  { %v965_v43 = vpop.f32.mrf.mxu1 }
 0x1c8   :  { %v377_v49 = vadd.f32 %v965_v43, %v839_v45 }
 0x1c9   :  { %v368_v44 = vpop.f32.mrf.mxu1 }
 0x1ca   :  { %v369_v47 = vadd.f32 %v839_v45, %v368_v44  ;;  %v433_v56 = vmax.f32 %v377_v49, 0.0 }
 0x1cb   :  { %v966_v46 = vpop.f32.mrf.mxu1 }
 0x1cc   :  { %v380_v48 = vadd.f32 %v966_v46, %v839_v45  ;;  %v431_v54 = vmax.f32 %v369_v47, 0.0 }
 0x1cd   :  { %v371_v50 = vpop.f32.mrf.mxu1 }
 0x1ce   :  { %v372_v51 = vadd.f32 %v839_v45, %v371_v50  ;;  %v434_v52 = vmax.f32 %v380_v48, 0.0 }
 0x1cf   :  { %v969_v53 = vpop.f32.mrf.mxu1 }
 0x1d0   :  { %v432_v55 = vmax.f32 %v372_v51, 0.0  ;;  %v448_v59 = vpack.c.bf16 %v434_v52, %v433_v56  ;;  %v393_v63 = vadd.f32 %v969_v53, %v839_v45 }
 0x1d1   :  { %v384_v57 = vpop.f32.mrf.mxu1 }
 0x1d2   :  { %v447_v58 = vpack.c.bf16 %v432_v55, %v431_v54  ;;  %v385_v61 = vadd.f32 %v839_v45, %v384_v57  ;;  %v437_v6 = vmax.f32 %v393_v63, 0.0 }
 0x1d3   :  { %v970_v60 = vpop.f32.mrf.mxu1 }
 0x1d4   :  { %v396_v62 = vadd.f32 %v970_v60, %v839_v45  ;;  %983 = vmatprep.mubr.msk.bf16.mxu1 %vm471_vm1, %v447_v58  ;;  %v435_v4 = vmax.f32 %v385_v61, 0.0 }
 0x1d5   :  { %v387_v0 = vpop.f32.mrf.mxu1  ;;  %984 = vmatmul.mubr.msk.bf16.vlgmr.msra.gmra.mxu1 %vm471_vm1, %v448_v59 }
 0x1d6   :  { %v388_v1 = vadd.f32 %v839_v45, %v387_v0  ;;  %v438_v2 = vmax.f32 %v396_v62, 0.0 }
 0x1d7   :  { %v973_v3 = vpop.f32.mrf.mxu1 }
 0x1d8   :  { %v436_v5 = vmax.f32 %v388_v1, 0.0  ;;  %v450_v16 = vpack.c.bf16 %v438_v2, %v437_v6  ;;  %v409_v20 = vadd.f32 %v973_v3, %v839_v45  ;;  %v1162_v3 = vmov 0.0  }
 0x1d9   :  { %v400_v7 = vpop.f32.mrf.mxu1  ;;  %1031 = vmatprep.subr.mxu1 %v1162_v3 }
 0x1da   :  { %v449_v8 = vpack.c.bf16 %v436_v5, %v435_v4  ;;  %v401_v18 = vadd.f32 %v839_v45, %v400_v7  ;;  %v441_v27 = vmax.f32 %v409_v20, 0.0 }
 0x1db   :  { %v974_v17 = vpop.f32.mrf.mxu1 }
 0x1dc   :  { %v412_v19 = vadd.f32 %v974_v17, %v839_v45  ;;  %987 = vmatprep.mubr.msk.bf16.mxu1 %vm471_vm1, %v449_v8  ;;  %v439_v25 = vmax.f32 %v401_v18, 0.0  ;;  %v859_v18 = vld [vmem:[%s1363_s5] ss:$0 sm:$0xff] }
 0x1dd   :  { %v403_v21 = vpop.f32.mrf.mxu1  ;;  %988 = vmatmul.mubr.msk.bf16.gmra.mxu1 %vm471_vm1, %v450_v16 }
 0x1de   :  { %v404_v22 = vadd.f32 %v839_v45, %v403_v21  ;;  %v442_v23 = vmax.f32 %v412_v19, 0.0 }
 0x1df   :  { %v977_v24 = vpop.f32.mrf.mxu1 }
 0x1e0   :  { %v440_v26 = vmax.f32 %v404_v22, 0.0  ;;  %v452_v30 = vpack.c.bf16 %v442_v23, %v441_v27  ;;  %v425_v34 = vadd.f32 %v977_v24, %v839_v45 }
 0x1e1   :  { %v416_v28 = vpop.f32.mrf.mxu1 }
 0x1e2   :  { %v451_v29 = vpack.c.bf16 %v440_v26, %v439_v25  ;;  %v417_v32 = vadd.f32 %v839_v45, %v416_v28  ;;  %v445_v40 = vmax.f32 %v425_v34, 0.0 }
 0x1e3   :  { %v978_v31 = vpop.f32.mrf.mxu1 }
 0x1e4   :  { %v428_v33 = vadd.f32 %v978_v31, %v839_v45  ;;  %991 = vmatprep.mubr.msk.bf16.mxu1 %vm471_vm1, %v451_v29  ;;  %v443_v38 = vmax.f32 %v417_v32, 0.0 }
 0x1e5   :  { %v419_v35 = vpop.f32.mrf.mxu1  ;;  %992 = vmatmul.mubr.msk.bf16.gmra.mxu1 %vm471_vm1, %v452_v30 }
 0x1e6   :  { %v420_v36 = vadd.f32 %v839_v45, %v419_v35  ;;  %v446_v37 = vmax.f32 %v428_v33, 0.0 }
 0x1e8   :  { %v444_v39 = vmax.f32 %v420_v36, 0.0  ;;  %v454_v42 = vpack.c.bf16 %v446_v37, %v445_v40 }
 0x1ea   :  { %v453_v41 = vpack.c.bf16 %v444_v39, %v443_v38 }
 0x1ec   :  { %995 = vmatprep.mubr.msk.bf16.mxu1 %vm471_vm1, %v453_v41 }
 0x1ed   :  { %996 = vmatmul.mubr.msk.bf16.gmra.mxu1 %vm471_vm1, %v454_v42 }
 0x1ee   :  { %1063 = vmatprep.mubr.msk.f32.mxu1 %vm1163_vm2, %v1162_v3 }
 0x295   :  { %v985_v43 = vpop.f32.mrf.mxu1 }
 0x297   :  { %v530_v44 = vpop.f32.mrf.mxu1 }
 0x299   :  { %v986_v46 = vpop.f32.mrf.mxu1 }
 0x29a   :  { %v594_v1 = vpack.c.bf16 %v986_v46, %v985_v43 }
 0x29b   :  { %v533_v47 = vpop.f32.mrf.mxu1 }
 0x29c   :  { %v593_v2 = vpack.c.bf16 %v533_v47, %v530_v44 }
 0x29d   :  { %v989_v48 = vpop.f32.mrf.mxu1 }
 0x29f   :  { %v546_v49 = vpop.f32.mrf.mxu1 }
 0x2a1   :  { %v990_v50 = vpop.f32.mrf.mxu1 }
 0x2a2   :  { %v596_v63 = vpack.c.bf16 %v990_v50, %v989_v48 }
 0x2a3   :  { %v549_v51 = vpop.f32.mrf.mxu1 }
 0x2a4   :  { %v595_v0 = vpack.c.bf16 %v549_v51, %v546_v49 }
 0x2a5   :  { %v993_v52 = vpop.f32.mrf.mxu1 }
 0x2a7   :  { %v562_v45 = vpop.f32.mrf.mxu1 }
 0x2a9   :  { %v994_v53 = vpop.f32.mrf.mxu1 }
 0x2aa   :  { %v598_v61 = vpack.c.bf16 %v994_v53, %v993_v52  ;;  %v721_v53 = vld [vmem:[#allocation6] sm:$0xff] }
 0x2ab   :  { %v565_v54 = vpop.f32.mrf.mxu1 }
 0x2ac   :  { %v597_v62 = vpack.c.bf16 %v565_v54, %v562_v45  ;;  %v860_v54 = vld [vmem:[%s1365_s7] ss:$0 sm:$0xff] }
 0x2ad   :  { %v997_v55 = vpop.f32.mrf.mxu1 }
 0x2af   :  { %v578_v56 = vpop.f32.mrf.mxu1 }
 0x2b1   :  { %v998_v57 = vpop.f32.mrf.mxu1 }
 0x2b2   :  { %v600_v58 = vpack.c.bf16 %v998_v57, %v997_v55 }
 0x2b3   :  { %v581_v59 = vpop.f32.mrf.mxu1 }
 0x2b4   :  { %v599_v60 = vpack.c.bf16 %v581_v59, %v578_v56  ;;  %999 = vmatprep.subr.bf16.mxu0 %v600_v58  ;;  %v804_v59 = vstv %s1366_s8 }
 0x2b5   :  { %1000 = vmatpush3.bf16.msra.mxu0 %v600_v58 }
 0x2b6   :  { %1001 = vmatprep.subr.bf16.mxu0 %v599_v60 }
 0x2b9   :  { %1002 = vmatpush3.bf16.msra.mxu0 %v599_v60 }
 0x2ba   :  { %1003 = vmatprep.subr.bf16.mxu0 %v598_v61 }
 0x2bd   :  { %1004 = vmatpush3.bf16.msra.mxu0 %v598_v61 }
 0x2be   :  { %1005 = vmatprep.subr.bf16.mxu0 %v597_v62 }
 0x2c1   :  { %1006 = vmatpush3.bf16.msra.mxu0 %v597_v62 }
 0x2c2   :  { %1007 = vmatprep.subr.bf16.mxu0 %v596_v63 }
 0x2c5   :  { %1008 = vmatpush3.bf16.msra.mxu0 %v596_v63 }
 0x2c6   :  { %1009 = vmatprep.subr.bf16.mxu0 %v595_v0 }
 0x2c9   :  { %1010 = vmatpush3.bf16.msra.mxu0 %v595_v0 }
 0x2ca   :  { %1011 = vmatprep.subr.bf16.mxu0 %v594_v1 }
 0x2cd   :  { %1012 = vmatpush3.bf16.msra.mxu0 %v594_v1 }
 0x2ce   :  { %1013 = vmatprep.subr.bf16.mxu0 %v593_v2 }
 0x2d1   :  { %1014 = vmatpush3.bf16.msra.mxu0 %v593_v2 }
 0x2d4   :  { %1016 = vmatmul.mubr.bf16.vlgmr.msra.gmra.mxu0 %v1251_v9 }
 0x2d5   :  { %1019 = vmatprep.mubr.bf16.mxu0 %v1256_v10 }
 0x2dc   :  { %1020 = vmatmul.mubr.bf16.gmra.mxu0 %v1263_v11 }
 0x2dd   :  { %1023 = vmatprep.mubr.bf16.mxu0 %v1268_v12 }
 0x2e4   :  { %1024 = vmatmul.mubr.bf16.gmra.mxu0 %v1275_v13 }
 0x2e5   :  { %1027 = vmatprep.mubr.bf16.mxu0 %v1280_v14 }
 0x2ec   :  { %1028 = vmatmul.mubr.bf16.gmra.mxu0 %v1287_v15 }
 0x394   :  { %v1017_v4 = vpop.f32.mrf.mxu0 }
 0x395   :  { %v651_v46 = vadd.f32 %v1017_v4, %v859_v18 }
 0x396   :  { %v1324_v9 = vpop.f32.mrf.mxu0 }
 0x397   :  { %v707_v50 = vmax.f32 %v651_v46, 0.0  ;;  %v643_v51 = vadd.f32 %v859_v18, %v1324_v9 }
 0x398   :  { %v1018_v10 = vpop.f32.mrf.mxu0 }
 0x399   :  { %v654_v43 = vadd.f32 %v1018_v10, %v859_v18  ;;  %v705_v45 = vmax.f32 %v643_v51, 0.0 }
 0x39a   :  { %v1326_v5 = vpop.f32.mrf.mxu0 }
 0x39b   :  { %v708_v48 = vmax.f32 %v654_v43, 0.0  ;;  %v646_v49 = vadd.f32 %v859_v18, %v1326_v5 }
 0x39c   :  { %v1021_v11 = vpop.f32.mrf.mxu0 }
 0x39d   :  { %v667_v37 = vadd.f32 %v1021_v11, %v859_v18  ;;  %v706_v52 = vmax.f32 %v646_v49, 0.0 }
 0x39e   :  { %v658_v12 = vpop.f32.mrf.mxu0 }
 0x39f   :  { %v711_v41 = vmax.f32 %v667_v37, 0.0  ;;  %v659_v42 = vadd.f32 %v859_v18, %v658_v12 }
 0x3a0   :  { %v1022_v6 = vpop.f32.mrf.mxu0 }
 0x3a1   :  { %v670_v35 = vadd.f32 %v1022_v6, %v859_v18  ;;  %v709_v47 = vmax.f32 %v659_v42, 0.0 }
 0x3a2   :  { %v661_v13 = vpop.f32.mrf.mxu0 }
 0x3a3   :  { %v712_v39 = vmax.f32 %v670_v35, 0.0  ;;  %v662_v40 = vadd.f32 %v859_v18, %v661_v13 }
 0x3a4   :  { %v1025_v7 = vpop.f32.mrf.mxu0 }
 0x3a5   :  { %v683_v29 = vadd.f32 %v1025_v7, %v859_v18  ;;  %v710_v44 = vmax.f32 %v662_v40, 0.0 }
 0x3a6   :  { %v674_v14 = vpop.f32.mrf.mxu0 }
 0x3a7   :  { %v715_v33 = vmax.f32 %v683_v29, 0.0  ;;  %v675_v34 = vadd.f32 %v859_v18, %v674_v14 }
 0x3a8   :  { %v1026_v8 = vpop.f32.mrf.mxu0 }
 0x3a9   :  { %v686_v27 = vadd.f32 %v1026_v8, %v859_v18  ;;  %v713_v38 = vmax.f32 %v675_v34, 0.0 }
 0x3aa   :  { %v677_v15 = vpop.f32.mrf.mxu0 }
 0x3ab   :  { %v716_v31 = vmax.f32 %v686_v27, 0.0  ;;  %v678_v32 = vadd.f32 %v859_v18, %v677_v15 }
 0x3ac   :  { %v1029_v16 = vpop.f32.mrf.mxu0 }
 0x3ad   :  { %v699_v20 = vadd.f32 %v1029_v16, %v859_v18  ;;  %v714_v36 = vmax.f32 %v678_v32, 0.0 }
 0x3ae   :  { %v690_v17 = vpop.f32.mrf.mxu0 }
 0x3af   :  { %v719_v25 = vmax.f32 %v699_v20, 0.0  ;;  %v691_v26 = vadd.f32 %v859_v18, %v690_v17 }
 0x3b0   :  { %v1030_v19 = vpop.f32.mrf.mxu0 }
 0x3b1   :  { %v702_v21 = vadd.f32 %v1030_v19, %v859_v18  ;;  %v717_v30 = vmax.f32 %v691_v26, 0.0 }
 0x3b2   :  { %v693_v22 = vpop.f32.mrf.mxu0 }
 0x3b3   :  { %v720_v23 = vmax.f32 %v702_v21, 0.0  ;;  %v694_v24 = vadd.f32 %v859_v18, %v693_v22 }
 0x3b5   :  { %1032 = vmatpush3.msra.mxu1 %v720_v23  ;;  %v718_v28 = vmax.f32 %v694_v24, 0.0 }
 0x3b6   :  { %1033 = vmatprep.subr.mxu1 %v1162_v3 }
 0x3b7   :  { %1034 = vmatpush3.msra.mxu1 %v719_v25 }
 0x3b8   :  { %1035 = vmatprep.subr.mxu1 %v1162_v3 }
 0x3b9   :  { %1036 = vmatpush3.msra.mxu1 %v718_v28 }
 0x3ba   :  { %1037 = vmatprep.subr.mxu1 %v1162_v3 }
 0x3bb   :  { %1038 = vmatpush3.msra.mxu1 %v717_v30 }
 0x3bc   :  { %1039 = vmatprep.subr.mxu1 %v1162_v3 }
 0x3bd   :  { %1040 = vmatpush3.msra.mxu1 %v716_v31 }
 0x3be   :  { %1041 = vmatprep.subr.mxu1 %v1162_v3 }
 0x3bf   :  { %1042 = vmatpush3.msra.mxu1 %v715_v33 }
 0x3c0   :  { %1043 = vmatprep.subr.mxu1 %v1162_v3 }
 0x3c1   :  { %1044 = vmatpush3.msra.mxu1 %v714_v36 }
 0x3c2   :  { %1045 = vmatprep.subr.mxu1 %v1162_v3 }
 0x3c3   :  { %1046 = vmatpush3.msra.mxu1 %v713_v38 }
 0x3c4   :  { %1047 = vmatprep.subr.mxu1 %v1162_v3 }
 0x3c5   :  { %1048 = vmatpush3.msra.mxu1 %v712_v39 }
 0x3c6   :  { %1049 = vmatprep.subr.mxu1 %v1162_v3 }
 0x3c7   :  { %1050 = vmatpush3.msra.mxu1 %v711_v41 }
 0x3c8   :  { %1051 = vmatprep.subr.mxu1 %v1162_v3 }
 0x3c9   :  { %1052 = vmatpush3.msra.mxu1 %v710_v44 }
 0x3ca   :  { %1053 = vmatprep.subr.mxu1 %v1162_v3 }
 0x3cb   :  { %1054 = vmatpush3.msra.mxu1 %v709_v47 }
 0x3cc   :  { %1055 = vmatprep.subr.mxu1 %v1162_v3 }
 0x3cd   :  { %1056 = vmatpush3.msra.mxu1 %v708_v48 }
 0x3ce   :  { %1057 = vmatprep.subr.mxu1 %v1162_v3 }
 0x3cf   :  { %1058 = vmatpush3.msra.mxu1 %v707_v50 }
 0x3d0   :  { %1059 = vmatprep.subr.mxu1 %v1162_v3 }
 0x3d1   :  { %1060 = vmatpush3.msra.mxu1 %v706_v52 }
 0x3d2   :  { %1061 = vmatprep.subr.mxu1 %v1162_v3 }
 0x3d3   :  { %1062 = vmatpush3.msra.mxu1 %v705_v45 }
 0x3d4   :  { %1064 = vmatmul.mubr.f32.vlgmr.msra.gmra.mxu1 %v721_v53 }
 0x494   :  { %v788_v55 = vpop.f32.mrf.mxu1 }
 0x495   :  { %v799_v56 = vmul.f32 %v860_v54, %v788_v55 }
 0x496   :  { %v1065_v57 = vpop.f32.mrf.mxu1 }
 0x497   :  { %v800_v58 = vsel %vm471_vm1, %v799_v56, 0.0 }
 0x498   :  { %801 = vadd.xlane.f32.xlu0 %v800_v58 }
 0x521   :  { %v802_v60 = vpop.xlane.xlu0 %801 }
 0x522   :  { %v805_v61 = vadd.f32 %v804_v59, %v802_v60 }
 0x524   :  { %806 = vst [vmem:[#allocation8] sm:$0xff] %v805_v61 }
 0x525   :  { %1143 = shalt.err (!%p1140_p0)
}
 0x526   :  { %816 = dma.vmem_to_hbm [thread:$0]  %s814_s15, 128, %s1367_s9, [#allocation5]  }
 0x527   :  { %1156 = dma.done.wait [#allocation5], 128  }
 0x528   :  { %1157 = vsyncadd [#allocation5], 4294967168 }
 0x529   :  { %820 = vsyncpa [#allocation4], 1 }
 0x52a   :  { %821 = vsyncpa [#allocation7], 1 }
 0x52b   :  { %822 = vsyncpa [#allocation5], 1 }

</bundles_post_ra>
